<compile_context>
chip_gen: v6e
topology: v6e:2x2x1
jax: 0.10.0
libtpu: 0.0.40
codegen_flags: <defaults>
</compile_context>

<pallas_src>
import functools
import math

import jax
import jax.numpy as jnp
from jax.experimental import pallas as pl
from jax.experimental.pallas import tpu as pltpu

_SQRT_2_OVER_PI = math.sqrt(2.0 / math.pi)


def _round_up(x, m):
    return (x + m - 1) // m * m


def _gelu_tanh(x):
    # Exact replica of the reference gelu (tanh approximation), computed in f32.
    # x*x*x instead of x**3: avoids pow lowering, one fewer VALU op.
    x3 = x * x * x
    return 0.5 * x * (1.0 + jnp.tanh(_SQRT_2_OVER_PI * (x + 0.044715 * x3)))
    # TODO(synk): on v6e/v7x the GELU polynomial could run in bf16 (bf16 VPU/EUP);
    # kept f32 so the same kernel is numerically safe on v5e.


def _make_mlp_kernel(ns_slab):
    """Kernel for one row tile: gelu(x @ W_fc + b_fc) @ W_proj + b_proj.

    The hidden (n_state) dimension is processed in ns_slab-column slabs so the
    live f32 intermediate is (TM, ns_slab) instead of (TM, n_state), and Mosaic
    can overlap GELU (VPU/EUP) of slab s with MXU work on slab s+1.
    """

    def mlp_kernel(x_ref, w_fc_ref, b_fc_ref, w_proj_ref, b_proj_ref, o_ref):
        x = x_ref[...]                                          # (TM, nx_p)
        ns_p = w_fc_ref.shape[1]
        acc = jnp.zeros((x_ref.shape[0], o_ref.shape[1]), jnp.float32)
        for s in range(ns_p // ns_slab):                        # static, unrolled
            c0 = s * ns_slab
            h = jnp.dot(x, w_fc_ref[:, c0:c0 + ns_slab],
                        preferred_element_type=jnp.float32)     # MXU, f32 acc
            h = _gelu_tanh(h + b_fc_ref[:, c0:c0 + ns_slab])    # VPU/EUP in f32
            acc = acc + jnp.dot(h.astype(w_proj_ref.dtype),
                                w_proj_ref[c0:c0 + ns_slab, :],
                                preferred_element_type=jnp.float32)
        # TODO(synk): dropout is identity in eval mode; training-mode dropout
        # would use pltpu.prng_seed + pltpu.stateful_bernoulli here.
        o_ref[...] = (acc + b_proj_ref[...]).astype(o_ref.dtype)

    return mlp_kernel


def prepare_mlp_params(w_fc, b_fc, w_proj, b_proj, *, matmul_dtype=jnp.bfloat16):
    """One-time weight preparation (hoisted out of the per-call hot path).

    Pads feature dims to lane-dense multiples of 128 and casts the MXU weight
    operands to matmul_dtype (bf16 by default); biases stay f32.
    """
    nx, n_state = w_fc.shape
    nx_p = _round_up(nx, 128)
    ns_p = _round_up(n_state, 128)
    wd = w_fc.dtype if matmul_dtype is None else jnp.dtype(matmul_dtype)
    return {
        "w_fc": jnp.pad(w_fc.astype(wd), ((0, nx_p - nx), (0, ns_p - n_state))),
        "b_fc": jnp.pad(b_fc.astype(jnp.float32), (0, ns_p - n_state)).reshape(1, ns_p),
        "w_proj": jnp.pad(w_proj.astype(wd), ((0, ns_p - n_state), (0, nx_p - nx))),
        "b_proj": jnp.pad(b_proj.astype(jnp.float32), (0, nx_p - nx)).reshape(1, nx_p),
    }


def _pick_tm(M, tm):
    TM = _round_up(max(8, min(tm, M)), 8)
    # Guarantee >= 2 grid steps when M allows so both v7x TensorCores get work
    # under dimension_semantics=("parallel",).
    while TM > 8 and pl.cdiv(M, TM) < 2:
        TM = max(8, _round_up(TM // 2, 8))
    return TM


def _pick_slab(ns_p):
    # Chunk the hidden dim into <=512-column slabs (multiples of 128).
    if ns_p <= 512:
        return ns_p
    for cand in (512, 384, 256, 128):
        if ns_p % cand == 0:
            return cand
    return ns_p


@functools.partial(
    jax.jit,
    static_argnames=("TM", "ns_slab", "out_dtype", "single_buffer_weights"))
def _mlp_pallas(x2d, w_fc, b_fc, w_proj, b_proj, *, TM, ns_slab, out_dtype,
                single_buffer_weights):
    M_p, nx_p = x2d.shape
    ns_p = w_fc.shape[1]
    grid = (M_p // TM,)

    # Resident operands: constant index_map -> DMA'd once; with Buffered(1)
    # they also keep a single VMEM buffer instead of a pointless double buffer.
    wmode = {"pipeline_mode": pl.Buffered(1)} if single_buffer_weights else {}
    in_specs = [
        pl.BlockSpec((TM, nx_p), lambda i: (i, 0)),             # streamed x row tile
        pl.BlockSpec((nx_p, ns_p), lambda i: (0, 0), **wmode),  # resident W_fc
        pl.BlockSpec((1, ns_p), lambda i: (0, 0), **wmode),     # resident b_fc (f32)
        pl.BlockSpec((ns_p, nx_p), lambda i: (0, 0), **wmode),  # resident W_proj
        pl.BlockSpec((1, nx_p), lambda i: (0, 0), **wmode),     # resident b_proj (f32)
    ]

    w_itm = jnp.dtype(w_fc.dtype).itemsize
    x_itm = jnp.dtype(x2d.dtype).itemsize
    o_itm = jnp.dtype(out_dtype).itemsize
    wb = 1 if single_buffer_weights else 2

    # VMEM budget: resident weights/biases (wb buffers), double-buffered x/out
    # tiles, live f32 hidden slab + f32 accumulator, plus compiler slack.
    vmem_bytes = (
        wb * 2 * nx_p * ns_p * w_itm
        + wb * (ns_p + nx_p) * 4
        + 2 * TM * nx_p * (x_itm + o_itm)
        + TM * ns_slab * 4
        + TM * nx_p * 4
        + (4 << 20)
    )
    # Generation-aware cap: VMEM capacity minus ~16 MiB headroom (128 MiB on
    # v5e/v6e, 64 MiB per TensorCore on v7x); conservative fallback if unknown.
    try:
        cap = int(getattr(pltpu.get_tpu_info(), "vmem_capacity_bytes", 64 << 20))
    except Exception:  # pragma: no cover - hardware query unavailable
        cap = 64 << 20
    usable = max(cap - (16 << 20), 32 << 20)
    vmem_limit = int(min(usable, max(vmem_bytes, 16 << 20)))

    cost = pl.CostEstimate(
        flops=4 * M_p * nx_p * ns_p,                    # two matmuls
        transcendentals=M_p * ns_p,                     # one tanh per hidden element
        bytes_accessed=(M_p * nx_p * (x_itm + o_itm)
                        + 2 * nx_p * ns_p * w_itm
                        + (ns_p + nx_p) * 4),
    )

    return pl.pallas_call(
        _make_mlp_kernel(ns_slab),
        out_shape=jax.ShapeDtypeStruct((M_p, nx_p), out_dtype),
        grid=grid,
        in_specs=in_specs,
        out_specs=pl.BlockSpec((TM, nx_p), lambda i: (i, 0)),
        compiler_params=pltpu.CompilerParams(
            dimension_semantics=("parallel",),          # 2 TCs on v7x split row tiles
            vmem_limit_bytes=vmem_limit,
        ),
        cost_estimate=cost,
    )(x2d, w_fc, b_fc, w_proj, b_proj)


_SINGLE_BUFFER_OK = [True]  # flips to False if pl.Buffered(1) is unsupported here


def mlp_forward(x, params, *, tm=256):
    """x: (B, S, nx) -> (B, S, nx); params from prepare_mlp_params()."""
    B, S, nx = x.shape
    nx_p, ns_p = params["w_fc"].shape
    M = B * S
    TM = _pick_tm(M, tm)
    M_p = _round_up(M, TM)

    # Per-call x prep: cast to the MXU operand dtype; pad only when needed.
    x2d = x.astype(params["w_fc"].dtype).reshape(M, nx)
    if M_p != M or nx_p != nx:
        x2d = jnp.pad(x2d, ((0, M_p - M), (0, nx_p - nx)))

    kwargs = dict(TM=TM, ns_slab=_pick_slab(ns_p), out_dtype=x.dtype)
    args = (x2d, params["w_fc"], params["b_fc"], params["w_proj"], params["b_proj"])

    out2d = None
    if _SINGLE_BUFFER_OK[0]:
        try:
            out2d = _mlp_pallas(*args, single_buffer_weights=True, **kwargs)
        except Exception:
            # Fallback for environments where single-buffer pipeline_mode is
            # not supported; only costs the extra weight buffer in VMEM.
            _SINGLE_BUFFER_OK[0] = False
    if out2d is None:
        out2d = _mlp_pallas(*args, single_buffer_weights=False, **kwargs)

    return out2d[:M, :nx].reshape(B, S, nx)


def reference_mlp(x, w_fc, b_fc, w_proj, b_proj):
    h = _gelu_tanh(jnp.einsum("bsd,dh->bsh", x, w_fc) + b_fc)
    return jnp.einsum("bsh,hd->bsd", h, w_proj) + b_proj


if __name__ == "__main__":
    # Small GPT-2-style config: n_embd=32, n_state=4*n_embd=128.
    B, S, n_embd = 2, 8, 32
    n_state = 4 * n_embd

    key = jax.random.PRNGKey(0)
    kx, kwf, kwp = jax.random.split(key, 3)

    x = jax.random.normal(kx, (B, S, n_embd), dtype=jnp.float32)
    # Conv1D init: weight ~ N(0, 0.02), bias = 0 (deterministic via PRNGKey(0)).
    w_fc = 0.02 * jax.random.normal(kwf, (n_embd, n_state), dtype=jnp.float32)
    b_fc = jnp.zeros((n_state,), dtype=jnp.float32)
    w_proj = 0.02 * jax.random.normal(kwp, (n_state, n_embd), dtype=jnp.float32)
    b_proj = jnp.zeros((n_embd,), dtype=jnp.float32)

    ref = reference_mlp(x, w_fc, b_fc, w_proj, b_proj)

    # f32 MXU-operand path: matches the PyTorch module numerics closely.
    # tm=8 => 2 row tiles, exercising the M-tiled grid at this toy size.
    params_f32 = prepare_mlp_params(w_fc, b_fc, w_proj, b_proj,
                                    matmul_dtype=jnp.float32)
    out_f32 = jax.block_until_ready(mlp_forward(x, params_f32, tm=8))
    assert out_f32.shape == (B, S, n_embd)
    assert jnp.allclose(out_f32, ref, atol=1e-5, rtol=1e-5), \
        "f32 kernel mismatch vs reference"

    # Default bf16 MXU-operand path (f32 accumulation + f32 GELU); loose tolerance.
    params_bf16 = prepare_mlp_params(w_fc, b_fc, w_proj, b_proj)
    out_bf16 = jax.block_until_ready(mlp_forward(x, params_bf16, tm=8))
    assert out_bf16.shape == (B, S, n_embd)
    assert jnp.allclose(out_bf16, ref, atol=3e-2, rtol=3e-2), \
        "bf16 kernel mismatch vs reference"

    print("KERNEL_OK")
</pallas_src>

<mosaic_0001>
module attributes {stable_mosaic.version = 11 : i64} {
  func.func @mlp_kernel(%arg0: i32, %arg1: memref<8x128xf32, #tpu.memory_space<vmem>>, %arg2: memref<128x128xf32, #tpu.memory_space<vmem>>, %arg3: memref<1x128xf32, #tpu.memory_space<vmem>>, %arg4: memref<128x128xf32, #tpu.memory_space<vmem>>, %arg5: memref<1x128xf32, #tpu.memory_space<vmem>>, %arg6: memref<8x128xf32, #tpu.memory_space<vmem>>) attributes {dimension_semantics = [#tpu.dimension_semantics<parallel>], iteration_bounds = array<i64: 2>, scalar_prefetch = 0 : i64, scratch_operands = 0 : i64, tpu.core_type = #tpu.core_type<tc>, window_params = [{transform_indices = @transform_0, window_bounds = array<i64: 8, 128>}, {pipeline_mode = #tpu.pipeline_mode<synchronous>, transform_indices = @transform_1, window_bounds = array<i64: 128, 128>}, {pipeline_mode = #tpu.pipeline_mode<synchronous>, transform_indices = @transform_2, window_bounds = array<i64: 1, 128>}, {pipeline_mode = #tpu.pipeline_mode<synchronous>, transform_indices = @transform_3, window_bounds = array<i64: 128, 128>}, {pipeline_mode = #tpu.pipeline_mode<synchronous>, transform_indices = @transform_4, window_bounds = array<i64: 1, 128>}, {transform_indices = @transform_5, window_bounds = array<i64: 8, 128>}]} {
    %c0 = arith.constant 0 : index
    %c0_0 = arith.constant 0 : index
    %0 = vector.load %arg1[%c0, %c0_0] : memref<8x128xf32, #tpu.memory_space<vmem>>, vector<8x128xf32>
    %cst = arith.constant 0.000000e+00 : f32
    %1 = vector.broadcast %cst : f32 to vector<8x128xf32>
    %c0_1 = arith.constant 0 : index
    %c0_2 = arith.constant 0 : index
    %2 = vector.load %arg2[%c0_1, %c0_2] : memref<128x128xf32, #tpu.memory_space<vmem>>, vector<128x128xf32>
    %cst_3 = arith.constant dense<0.000000e+00> : vector<8x128xf32>
    %3 = tpu.matmul %0, %2, %cst_3 {dimension_numbers = #tpu.dot_dimension_numbers<[1], [0], [0], [1], [0, 0, 1, 1], [], []>} : vector<8x128xf32>, vector<128x128xf32>, vector<8x128xf32> -> vector<8x128xf32>
    %c0_4 = arith.constant 0 : index
    %c0_5 = arith.constant 0 : index
    %4 = vector.load %arg3[%c0_4, %c0_5] : memref<1x128xf32, #tpu.memory_space<vmem>>, vector<1x128xf32>
    %5 = vector.broadcast %4 : vector<1x128xf32> to vector<8x128xf32>
    %6 = arith.addf %3, %5 : vector<8x128xf32>
    %7 = arith.mulf %6, %6 : vector<8x128xf32>
    %8 = arith.mulf %7, %6 : vector<8x128xf32>
    %cst_6 = arith.constant 5.000000e-01 : f32
    %9 = vector.broadcast %cst_6 : f32 to vector<8x128xf32>
    %10 = arith.mulf %9, %6 : vector<8x128xf32>
    %cst_7 = arith.constant 4.471500e-02 : f32
    %11 = vector.broadcast %cst_7 : f32 to vector<8x128xf32>
    %12 = arith.mulf %11, %8 : vector<8x128xf32>
    %13 = arith.addf %6, %12 : vector<8x128xf32>
    %cst_8 = arith.constant 0.797884583 : f32
    %14 = vector.broadcast %cst_8 : f32 to vector<8x128xf32>
    %15 = arith.mulf %14, %13 : vector<8x128xf32>
    %16 = math.tanh %15 : vector<8x128xf32>
    %cst_9 = arith.constant 1.000000e+00 : f32
    %17 = vector.broadcast %cst_9 : f32 to vector<8x128xf32>
    %18 = arith.addf %17, %16 : vector<8x128xf32>
    %19 = arith.mulf %10, %18 : vector<8x128xf32>
    %c0_10 = arith.constant 0 : index
    %c0_11 = arith.constant 0 : index
    %20 = vector.load %arg4[%c0_10, %c0_11] : memref<128x128xf32, #tpu.memory_space<vmem>>, vector<128x128xf32>
    %cst_12 = arith.constant dense<0.000000e+00> : vector<8x128xf32>
    %21 = tpu.matmul %19, %20, %cst_12 {dimension_numbers = #tpu.dot_dimension_numbers<[1], [0], [0], [1], [0, 0, 1, 1], [], []>} : vector<8x128xf32>, vector<128x128xf32>, vector<8x128xf32> -> vector<8x128xf32>
    %22 = arith.addf %1, %21 : vector<8x128xf32>
    %c0_13 = arith.constant 0 : index
    %c0_14 = arith.constant 0 : index
    %23 = vector.load %arg5[%c0_13, %c0_14] : memref<1x128xf32, #tpu.memory_space<vmem>>, vector<1x128xf32>
    %24 = vector.broadcast %23 : vector<1x128xf32> to vector<8x128xf32>
    %25 = arith.addf %22, %24 : vector<8x128xf32>
    %c0_15 = arith.constant 0 : index
    %c0_16 = arith.constant 0 : index
    %26 = vector.load %arg6[%c0_15, %c0_16] : memref<8x128xf32, #tpu.memory_space<vmem>>, vector<8x128xf32>
    tpu.vector_store %arg6[%c0_15, %c0_16], %25 {strides = array<i32>} : memref<8x128xf32, #tpu.memory_space<vmem>>, vector<8x128xf32>,
    return
  }
  func.func @transform_0(%arg0: i32) -> (i32, i32) {
    %c0_i32 = arith.constant 0 : i32
    %c0_i32_0 = arith.constant 0 : i32
    return %arg0, %c0_i32 : i32, i32
  }
  func.func @transform_1(%arg0: i32) -> (i32, i32) {
    %c0_i32 = arith.constant 0 : i32
    %c0_i32_0 = arith.constant 0 : i32
    %c0_i32_1 = arith.constant 0 : i32
    return %c0_i32, %c0_i32_0 : i32, i32
  }
  func.func @transform_2(%arg0: i32) -> (i32, i32) {
    %c0_i32 = arith.constant 0 : i32
    %c0_i32_0 = arith.constant 0 : i32
    %c0_i32_1 = arith.constant 0 : i32
    return %c0_i32, %c0_i32_0 : i32, i32
  }
  func.func @transform_3(%arg0: i32) -> (i32, i32) {
    %c0_i32 = arith.constant 0 : i32
    %c0_i32_0 = arith.constant 0 : i32
    %c0_i32_1 = arith.constant 0 : i32
    return %c0_i32, %c0_i32_0 : i32, i32
  }
  func.func @transform_4(%arg0: i32) -> (i32, i32) {
    %c0_i32 = arith.constant 0 : i32
    %c0_i32_0 = arith.constant 0 : i32
    %c0_i32_1 = arith.constant 0 : i32
    return %c0_i32, %c0_i32_0 : i32, i32
  }
  func.func @transform_5(%arg0: i32) -> (i32, i32) {
    %c0_i32 = arith.constant 0 : i32
    %c0_i32_0 = arith.constant 0 : i32
    return %arg0, %c0_i32 : i32, i32
  }
}

module attributes {stable_mosaic.version = 11 : i64} {
  func.func @mlp_kernel(%arg0: i32, %arg1: memref<8x128xf32, #tpu.memory_space<vmem>>, %arg2: memref<128x128xf32, #tpu.memory_space<vmem>>, %arg3: memref<1x128xf32, #tpu.memory_space<vmem>>, %arg4: memref<128x128xf32, #tpu.memory_space<vmem>>, %arg5: memref<1x128xf32, #tpu.memory_space<vmem>>, %arg6: memref<8x128xf32, #tpu.memory_space<vmem>>) attributes {dimension_semantics = [#tpu.dimension_semantics<parallel>], iteration_bounds = array<i64: 2>, scalar_prefetch = 0 : i64, scratch_operands = 0 : i64, tpu.core_type = #tpu.core_type<tc>, window_params = [{transform_indices = @transform_0, window_bounds = array<i64: 8, 128>}, {pipeline_mode = #tpu.pipeline_mode<synchronous>, transform_indices = @transform_1, window_bounds = array<i64: 128, 128>}, {pipeline_mode = #tpu.pipeline_mode<synchronous>, transform_indices = @transform_2, window_bounds = array<i64: 1, 128>}, {pipeline_mode = #tpu.pipeline_mode<synchronous>, transform_indices = @transform_3, window_bounds = array<i64: 128, 128>}, {pipeline_mode = #tpu.pipeline_mode<synchronous>, transform_indices = @transform_4, window_bounds = array<i64: 1, 128>}, {transform_indices = @transform_5, window_bounds = array<i64: 8, 128>}]} {
    %c0 = arith.constant 0 : index
    %c0_0 = arith.constant 0 : index
    %0 = vector.load %arg1[%c0, %c0_0] : memref<8x128xf32, #tpu.memory_space<vmem>>, vector<8x128xf32>
    %cst = arith.constant 0.000000e+00 : f32
    %1 = vector.broadcast %cst : f32 to vector<8x128xf32>
    %c0_1 = arith.constant 0 : index
    %c0_2 = arith.constant 0 : index
    %2 = vector.load %arg2[%c0_1, %c0_2] : memref<128x128xf32, #tpu.memory_space<vmem>>, vector<128x128xf32>
    %cst_3 = arith.constant dense<0.000000e+00> : vector<8x128xf32>
    %3 = tpu.matmul %0, %2, %cst_3 {dimension_numbers = #tpu.dot_dimension_numbers<[1], [0], [0], [1], [0, 0, 1, 1], [], []>} : vector<8x128xf32>, vector<128x128xf32>, vector<8x128xf32> -> vector<8x128xf32>
    %c0_4 = arith.constant 0 : index
    %c0_5 = arith.constant 0 : index
    %4 = vector.load %arg3[%c0_4, %c0_5] : memref<1x128xf32, #tpu.memory_space<vmem>>, vector<1x128xf32>
    %5 = vector.broadcast %4 : vector<1x128xf32> to vector<8x128xf32>
    %6 = arith.addf %3, %5 : vector<8x128xf32>
    %7 = arith.mulf %6, %6 : vector<8x128xf32>
    %8 = arith.mulf %7, %6 : vector<8x128xf32>
    %cst_6 = arith.constant 5.000000e-01 : f32
    %9 = vector.broadcast %cst_6 : f32 to vector<8x128xf32>
    %10 = arith.mulf %9, %6 : vector<8x128xf32>
    %cst_7 = arith.constant 4.471500e-02 : f32
    %11 = vector.broadcast %cst_7 : f32 to vector<8x128xf32>
    %12 = arith.mulf %11, %8 : vector<8x128xf32>
    %13 = arith.addf %6, %12 : vector<8x128xf32>
    %cst_8 = arith.constant 0.797884583 : f32
    %14 = vector.broadcast %cst_8 : f32 to vector<8x128xf32>
    %15 = arith.mulf %14, %13 : vector<8x128xf32>
    %16 = math.tanh %15 : vector<8x128xf32>
    %cst_9 = arith.constant 1.000000e+00 : f32
    %17 = vector.broadcast %cst_9 : f32 to vector<8x128xf32>
    %18 = arith.addf %17, %16 : vector<8x128xf32>
    %19 = arith.mulf %10, %18 : vector<8x128xf32>
    %c0_10 = arith.constant 0 : index
    %c0_11 = arith.constant 0 : index
    %20 = vector.load %arg4[%c0_10, %c0_11] : memref<128x128xf32, #tpu.memory_space<vmem>>, vector<128x128xf32>
    %cst_12 = arith.constant dense<0.000000e+00> : vector<8x128xf32>
    %21 = tpu.matmul %19, %20, %cst_12 {dimension_numbers = #tpu.dot_dimension_numbers<[1], [0], [0], [1], [0, 0, 1, 1], [], []>} : vector<8x128xf32>, vector<128x128xf32>, vector<8x128xf32> -> vector<8x128xf32>
    %22 = arith.addf %1, %21 : vector<8x128xf32>
    %c0_13 = arith.constant 0 : index
    %c0_14 = arith.constant 0 : index
    %23 = vector.load %arg5[%c0_13, %c0_14] : memref<1x128xf32, #tpu.memory_space<vmem>>, vector<1x128xf32>
    %24 = vector.broadcast %23 : vector<1x128xf32> to vector<8x128xf32>
    %25 = arith.addf %22, %24 : vector<8x128xf32>
    %c0_15 = arith.constant 0 : index
    %c0_16 = arith.constant 0 : index
    %26 = vector.load %arg6[%c0_15, %c0_16] : memref<8x128xf32, #tpu.memory_space<vmem>>, vector<8x128xf32>
    tpu.vector_store %arg6[%c0_15, %c0_16], %25 {strides = array<i32>} : memref<8x128xf32, #tpu.memory_space<vmem>>, vector<8x128xf32>,
    return
  }
  func.func @transform_0(%arg0: i32) -> (i32, i32) {
    %c0_i32 = arith.constant 0 : i32
    %c0_i32_0 = arith.constant 0 : i32
    return %arg0, %c0_i32 : i32, i32
  }
  func.func @transform_1(%arg0: i32) -> (i32, i32) {
    %c0_i32 = arith.constant 0 : i32
    %c0_i32_0 = arith.constant 0 : i32
    %c0_i32_1 = arith.constant 0 : i32
    return %c0_i32, %c0_i32_0 : i32, i32
  }
  func.func @transform_2(%arg0: i32) -> (i32, i32) {
    %c0_i32 = arith.constant 0 : i32
    %c0_i32_0 = arith.constant 0 : i32
    %c0_i32_1 = arith.constant 0 : i32
    return %c0_i32, %c0_i32_0 : i32, i32
  }
  func.func @transform_3(%arg0: i32) -> (i32, i32) {
    %c0_i32 = arith.constant 0 : i32
    %c0_i32_0 = arith.constant 0 : i32
    %c0_i32_1 = arith.constant 0 : i32
    return %c0_i32, %c0_i32_0 : i32, i32
  }
  func.func @transform_4(%arg0: i32) -> (i32, i32) {
    %c0_i32 = arith.constant 0 : i32
    %c0_i32_0 = arith.constant 0 : i32
    %c0_i32_1 = arith.constant 0 : i32
    return %c0_i32, %c0_i32_0 : i32, i32
  }
  func.func @transform_5(%arg0: i32) -> (i32, i32) {
    %c0_i32 = arith.constant 0 : i32
    %c0_i32_0 = arith.constant 0 : i32
    return %arg0, %c0_i32 : i32, i32
  }
}

</mosaic_0001>

<bundles_post_ra>
// kernel: _mlp_pallas.1
= control target key start
LH: loop header
LB: loop body
LE: loop exit
PB: predicated region body
PF: predicated region fallthrough
CT: control target
= control target key end

     0   :  { %10 = vsyncpa [#allocation3], 0  ;;  %s1170_s0 = inlined_call_operand.hbm [shape: f32[16,128], index: 0, kind: input, shape index: {}]   ;;  %s1171_s1 = inlined_call_operand.hbm [shape: f32[128,128], index: 1, kind: input, shape index: {}]   ;;  %s1172_s2 = inlined_call_operand.vmem [shape: f32[1,128], index: 2, kind: input, shape index: {}]   ;;  %s1173_s3 = inlined_call_operand.hbm [shape: f32[128,128], index: 3, kind: input, shape index: {}]   ;;  %s1174_s4 = inlined_call_operand.vmem [shape: f32[1,128], index: 4, kind: input, shape index: {}]   ;;  %s1175_s5 = inlined_call_operand.hbm [shape: f32[16,128], index: 5, kind: output, shape index: {}]  }
   0x1   :  { %12 = vsyncpa [#allocation3 + $0x1], 0 }
   0x2   :  { %13 = vsyncpa [#allocation6], 0 }
   0x3   :  { %14 = vsyncpa [#allocation4], 0 }
   0x4   :  { %16 = vsyncpa [#allocation4 + $0x1], 0  ;;  %s952_s18 = smov 0   ;;  %s954_s19 = smov 0  }
   0x5   :  { %s956_s20 = smov 0   ;;  %s958_s21 = smov 0  }
   0x6 LB: > { %s973_s22 = sadd.s32 4294967295, %s912_s21   ;;  %s569_s23 = sadd.s32 4294967294, %s912_s21   ;;  %s912_s21 = sphi %s958_s21, %s1197_s21   ;;  %s908_s20 = sphi %s956_s20, %s1196_s20   ;;  %s904_s19 = sphi %s954_s19, %s1195_s19   ;;  %s900_s18 = sphi %s952_s18, %s1194_s18  }
   0x7   : > { %p42_p0 = scmp.ne.s32.totalorder %s904_s19, %s900_s18  ;;  %p1176_p1 = scmp.eq.s32.totalorder %s973_s22, 0 }
   0x8   : > { %p156_p3 = scmp.eq.s32.totalorder %s569_s23, 1  ;;  %p570_p5 = scmp.ge.s32.totalorder %s912_s21, 1 }
   0x9   : > { %p982_p4 = por %p1176_p1, %p42_p0  ;;  %p163_p7 = scmp.lt.s32.totalorder %s912_s21, 3 }
   0xa   : > { %p987_p6 = por %p156_p3, %p42_p0  ;;  %s914_s27 = smov [#allocation5]  }
   0xb   : > { %s1180_s24 = scalar_select %p982_p4, 1, 0 }
   0xc   : > { %s1181_s25 = scalar_select %p987_p6, 1, 0 }
   0xd   : > { %p992_p8 = pnand %p570_p5, %p163_p7  ;;  %s175_s28 = sshll.u32 %s914_s27, 4  ;;  %s176_s28 = int_to_ptr.vmem [resolvable:$true] %s175_s28 }
   0xe   : > { %s915_s30 = smov [#allocation7]   ;;  %s775_s7 = scalar_lea.vmem %s176_s28, 2048 }
   0xf   : > { %s1182_s26 = scalar_select %p992_p8, 1, 0 }
  0x10   : > { %p703_p9 = pneg %p992_p8  ;;  %s191_s6 = sshll.u32 %s915_s30, 4  ;;  %s192_s6 = int_to_ptr.vmem [resolvable:$true] %s191_s6 }
  0x11   : > { %p776_p13 = scmp.ne.s32.totalorder %s176_s28, %s775_s7  ;;  %p783_p5 = scmp.lt.s32.totalorder %s176_s28, %s176_s28 }
  0x12   : > { %p1001_p11 = pnand %p703_p9, %p1176_p1  ;;  %p784_p7 = scmp.lt.s32.totalorder %s775_s7, %s775_s7 }
  0x14   : > { %p766_p12 = pneg %p1001_p11  ;;  %p785_p10 = por %p784_p7, %p783_p5 }
  0x16   : > { %p778_p0 = pnand %p776_p13, %p766_p12 }
  0x18   : > { %p779_p3 = pneg %p778_p0 }
  0x1a   : > { %p786_p9 = pnand %p785_p10, %p779_p3 }
  0x1c   : > { %789 = shalt.err (!%p786_p9)
}
  0x1d   : > { %s916_s8 = smov 128   ;;  %s917_s9 = smov 8  }
  0x1e   : > { %706 = dma.hbm_to_vmem [thread:$0]  (!%p1001_p11), %s1171_s1, 2048, %s176_s28, [#allocation6], %s916_s8, %s916_s8, %s917_s9  }
  0x1f   : > { %s801_s12 = scalar_lea.vmem %s192_s6, 2048  ;;  %p809_p2 = scmp.lt.s32.totalorder %s192_s6, %s192_s6 }
  0x20   : > { %p802_p1 = scmp.ne.s32.totalorder %s192_s6, %s801_s12  ;;  %p810_p6 = scmp.lt.s32.totalorder %s801_s12, %s801_s12 }
  0x22   : > { %p804_p13 = pnand %p802_p1, %p766_p12  ;;  %p811_p5 = por %p810_p6, %p809_p2 }
  0x24   : > { %p805_p0 = pneg %p804_p13 }
  0x26   : > { %p812_p10 = pnand %p811_p5, %p805_p0 }
  0x28   : > { %815 = shalt.err (!%p812_p10)
}
  0x29   : > { %709 = dma.hbm_to_vmem [thread:$0]  (!%p1001_p11), %s1173_s3, 2048, %s192_s6, [#allocation6], %s916_s8, %s916_s8, %s917_s9  }
  0x2a   : > { %s1024_s15 = sadd.s32 1, %s912_s21   ;;  %s29_s16 = sadd.s32 1, %s908_s20 }
  0x2b   : > { %s26_s17 = ssub.s32 %s912_s21, %s1024_s15  ;;  %p36_p1 = scmp.ne.s32.totalorder %s908_s20, %s904_s19 }
  0x2c   : > { %p27_p2 = scmp.eq.s32.totalorder %s26_s17, 0  ;;  %p37_p6 = scmp.eq.s32.totalorder %s912_s21, 0 }
  0x2d   : > { %p1184_p12 = scmp.eq.s32.totalorder %s973_s22, 1  ;;  %p720_p7 = scmp.lt.s32.totalorder %s912_s21, 2 }
  0x2e   : > { %s1040_s27 = scalar_select %p27_p2, %s908_s20, %s29_s16  }
  0x2f   : > { %p1034_p3 = por %p1184_p12, %p36_p1  ;;  %p38_p9 = por %p37_p6, %p36_p1 }
  0x30   : > { %s208_s28 = sand.u32 1, %s908_s20   ;;  %s575_s30 = sshll.u32 %s912_s21, 7 }
  0x31   : > { %s1185_s23 = scalar_select %p1034_p3, 1, 0 }
  0x32   : > { %s574_s29 = sshll.u32 %s208_s28, 3  ;;  %s1047_s8 = scalar_lea.hbm %s1170_s0, %s575_s30 }
  0x33   : > { %s212_s9 = scalar_lea.vmem [#allocation2], %s574_s29  ;;  %p1049_p11 = pnand %p720_p7, %p38_p9 }
  0x34   : > { %s219_s10 = sshll.u32 %s212_s9, 4  ;;  %s209_s12 = scalar_lea.sflag [#allocation3], %s208_s28  ;;  %s220_s10 = int_to_ptr.vmem [resolvable:$true] %s219_s10 }
  0x35   : > { %s816_s13 = scalar_lea.hbm %s1047_s8, 128  ;;  %p818_p0 = pneg %p1049_p11 }
  0x36   : > { %p817_p13 = scmp.ne.s32.totalorder %s1047_s8, %s816_s13  ;;  %s821_s17 = scalar_lea.hbm %s1170_s0, 256 }
  0x37   : > { %p822_p1 = scmp.lt.s32.totalorder %s1047_s8, %s1170_s0  ;;  %p823_p2 = scmp.lt.s32.totalorder %s821_s17, %s816_s13 }
  0x38   : > { %p819_p5 = pnand %p818_p0, %p817_p13 }
  0x39   : > { %p824_p6 = por %p823_p2, %p822_p1 }
  0x3a   : > { %p820_p10 = pneg %p819_p5 }
  0x3c   : > { %p825_p12 = pnand %p824_p6, %p820_p10 }
  0x3e   : > { %828 = shalt.err (!%p825_p12)
}
  0x3f   : > { %s829_s6 = scalar_lea.vmem %s220_s10, 128  ;;  %s918_s28 = smov [#allocation2]  }
  0x40   : > { %p830_p7 = scmp.ne.s32.totalorder %s220_s10, %s829_s6  ;;  %s834_s7 = sshll.u32 %s918_s28, 4  ;;  %s835_s7 = int_to_ptr.vmem [resolvable:$false] %s834_s7 }
  0x41   : > { %s836_s9 = scalar_lea.vmem %s835_s7, 256  ;;  %p837_p13 = scmp.lt.s32.totalorder %s220_s10, %s835_s7 }
  0x42   : > { %p832_p9 = pnand %p830_p7, %p818_p0  ;;  %p838_p5 = scmp.lt.s32.totalorder %s836_s9, %s829_s6 }
  0x44   : > { %p833_p3 = pneg %p832_p9  ;;  %p839_p4 = por %p838_p5, %p837_p13 }
  0x46   : > { %p840_p8 = pnand %p839_p4, %p833_p3 }
  0x48   : > { %843 = shalt.err (!%p840_p8)
}
  0x49   : > { %713 = dma.hbm_to_vmem [thread:$0]  (!%p1049_p11), %s1047_s8, 128, %s220_s10, %s209_s12  }
  0x4a   : > { %p1187_p10 = scmp.ne.s32.totalorder %s1182_s26, 0 }
  0x4b   : > { %s1070_s13 = sand.u32 (!%p1187_p10), 1, %s904_s19   ;;  %p1188_p4 = scmp.ne.s32.totalorder (!%p1187_p10), %s1180_s24, 0 }
  0x4c   : > { %228 = sbr.rel (%p1187_p10) target bundleno = 550 (0x226), region = 40  ;;  %s577_s14 = sshll.u32 (!%p1187_p10), %s1070_s13, 3 }
  0x4d   : > { %s231_s16 = scalar_lea.sflag (!%p1187_p10), [#allocation3], %s1070_s13  ;;  %s1076_s17 = scalar_lea.vmem (!%p1187_p10), [#allocation2], %s577_s14 }
  0x51   : > { %887 = dma.done.wait (%p1188_p4), %s231_s16, 128  }
  0x52   : > { %889 = vsyncadd (%p1188_p4), %s231_s16, 4294967168  ;;  %p1189_p8 = scmp.eq.s32.totalorder %s973_s22, 0 }
  0x54   : > { %891 = dma.done.wait (%p1189_p8), [#allocation6], 4096   ;;  %p1190_p3 = pmov %p1189_p8 }
  0x55   : > { %v919_v0 = vmov 0.0   ;;  %vm920_vm0 = vmmov 0   ;;  %v285_v1 = vld [vmem:[#allocation5 + $0x78] sm:$0xff]  ;;  %v284_v2 = vld [vmem:[#allocation5 + $0x70] sm:$0xff]  ;;  %v283_v3 = vld [vmem:[#allocation5 + $0x68] sm:$0xff]  ;;  %s584_s11 = sshll.u32 %s973_s22, 7 }
  0x56   : > { %893 = vsyncadd (%p1190_p3), [#allocation6], 4294963200  ;;  %621 = vmatprep.subr.mxu0 %v919_v0  ;;  %653 = vmatprep.mubr.msk.f32.mxu0 %vm920_vm0, %v919_v0  ;;  %v282_v4 = vld [vmem:[#allocation5 + $0x60] sm:$0xff]  ;;  %v281_v5 = vld [vmem:[#allocation5 + $0x58] sm:$0xff]  ;;  %s268_s12 = scalar_lea.vmem [#allocation8], %s577_s14  ;;  %s1133_s28 = scalar_lea.hbm %s1175_s5, %s584_s11 }
  0x57   : > { %656 = vmatprep.subr.mxu1 %v919_v0  ;;  %688 = vmatprep.mubr.msk.f32.mxu1 %vm920_vm0, %v919_v0  ;;  %v280_v6 = vld [vmem:[#allocation5 + $0x50] sm:$0xff]  ;;  %v279_v7 = vld [vmem:[#allocation5 + $0x48] sm:$0xff]  ;;  %v278_v8 = vld [vmem:[#allocation5 + $0x40] sm:$0xff]  ;;  %s480_s30 = sshll.u32 %s268_s12, 4  ;;  %s467_s7 = scalar_lea.sflag [#allocation4], %s1070_s13  ;;  %s481_s30 = int_to_ptr.vmem [resolvable:$true] %s480_s30 }
  0x58   : > { %622 = vmatpush3.msra.mxu0 %v285_v1  ;;  %v277_v9 = vld [vmem:[#allocation5 + $0x38] sm:$0xff]  ;;  %v276_v10 = vld [vmem:[#allocation5 + $0x30] sm:$0xff]  ;;  %v275_v11 = vld [vmem:[#allocation5 + $0x28] sm:$0xff]  ;;  %s844_s9 = scalar_lea.vmem %s481_s30, 128  ;;  %p1191_p0 = scmp.ne.s32.totalorder %s1185_s23, 0 }
  0x59   : > { %623 = vmatprep.subr.mxu0 %v919_v0  ;;  %v274_v12 = vld [vmem:[#allocation5 + $0x20] sm:$0xff]  ;;  %v273_v13 = vld [vmem:[#allocation5 + $0x18] sm:$0xff]  ;;  %v272_v14 = vld [vmem:[#allocation5 + $0x10] sm:$0xff]  ;;  %p845_p11 = scmp.ne.s32.totalorder %s481_s30, %s844_s9  ;;  %s921_s22 = smov [#allocation8]  }
  0x5a   : > { %624 = vmatpush3.msra.mxu0 %v284_v2  ;;  %v271_v15 = vld [vmem:[#allocation5 + $0x8] sm:$0xff]  ;;  %v270_v16 = vld [vmem:[#allocation5] sm:$0xff]  ;;  %v269_v17 = vld [vmem:[%s1076_s17] sm:$0xff]  ;;  %s848_s16 = sshll.u32 %s921_s22, 4  ;;  %s849_s16 = int_to_ptr.vmem [resolvable:$false] %s848_s16 }
  0x5b   : > { %625 = vmatprep.subr.mxu0 %v919_v0  ;;  %v387_v18 = vld [vmem:[#allocation7 + $0x78] sm:$0xff]  ;;  %v386_v19 = vld [vmem:[#allocation7 + $0x70] sm:$0xff]  ;;  %v385_v20 = vld [vmem:[#allocation7 + $0x68] sm:$0xff]  ;;  %p846_p1 = pnand %p845_p11, %p1191_p0  ;;  %s850_s14 = scalar_lea.vmem %s849_s16, 256 }
  0x5c   : > { %626 = vmatpush3.msra.mxu0 %v283_v3  ;;  %657 = vmatpush3.msra.mxu1 %v387_v18  ;;  %v384_v21 = vld [vmem:[#allocation7 + $0x60] sm:$0xff]  ;;  %v383_v22 = vld [vmem:[#allocation7 + $0x58] sm:$0xff]  ;;  %v382_v23 = vld [vmem:[#allocation7 + $0x50] sm:$0xff]  ;;  %p851_p6 = scmp.lt.s32.totalorder %s481_s30, %s849_s16  ;;  %p852_p12 = scmp.lt.s32.totalorder %s850_s14, %s844_s9 }
  0x5d   : > { %627 = vmatprep.subr.mxu0 %v919_v0  ;;  %658 = vmatprep.subr.mxu1 %v919_v0  ;;  %v381_v24 = vld [vmem:[#allocation7 + $0x48] sm:$0xff]  ;;  %v380_v25 = vld [vmem:[#allocation7 + $0x40] sm:$0xff]  ;;  %v379_v26 = vld [vmem:[#allocation7 + $0x38] sm:$0xff]  ;;  %p847_p2 = pneg %p846_p1 }
  0x5e   : > { %628 = vmatpush3.msra.mxu0 %v282_v4  ;;  %659 = vmatpush3.msra.mxu1 %v386_v19  ;;  %v378_v27 = vld [vmem:[#allocation7 + $0x30] sm:$0xff]  ;;  %v377_v28 = vld [vmem:[#allocation7 + $0x28] sm:$0xff]  ;;  %v376_v29 = vld [vmem:[#allocation7 + $0x20] sm:$0xff]  ;;  %p853_p7 = por %p852_p12, %p851_p6 }
  0x5f   : > { %629 = vmatprep.subr.mxu0 %v919_v0  ;;  %660 = vmatprep.subr.mxu1 %v919_v0  ;;  %v375_v30 = vld [vmem:[#allocation7 + $0x18] sm:$0xff]  ;;  %v374_v31 = vld [vmem:[#allocation7 + $0x10] sm:$0xff]  ;;  %v373_v32 = vld [vmem:[#allocation7 + $0x8] sm:$0xff] }
  0x60   : > { %630 = vmatpush3.msra.mxu0 %v281_v5  ;;  %661 = vmatpush3.msra.mxu1 %v385_v20  ;;  %v372_v33 = vld [vmem:[#allocation7] sm:$0xff]  ;;  %v581_v34 = vld [vmem:[%s1172_s2] ss:$0 sm:$0xff]  ;;  %p854_p9 = pnand %p853_p7, %p847_p2 }
  0x61   : > { %631 = vmatprep.subr.mxu0 %v919_v0  ;;  %662 = vmatprep.subr.mxu1 %v919_v0  ;;  %v582_v47 = vld [vmem:[%s1174_s4] ss:$0 sm:$0xff] }
  0x62   : > { %632 = vmatpush3.msra.mxu0 %v280_v6  ;;  %663 = vmatpush3.msra.mxu1 %v384_v21 }
  0x63   : > { %633 = vmatprep.subr.mxu0 %v919_v0  ;;  %664 = vmatprep.subr.mxu1 %v919_v0 }
  0x64   : > { %634 = vmatpush3.msra.mxu0 %v279_v7  ;;  %665 = vmatpush3.msra.mxu1 %v383_v22 }
  0x65   : > { %635 = vmatprep.subr.mxu0 %v919_v0  ;;  %666 = vmatprep.subr.mxu1 %v919_v0 }
  0x66   : > { %636 = vmatpush3.msra.mxu0 %v278_v8  ;;  %667 = vmatpush3.msra.mxu1 %v382_v23 }
  0x67   : > { %637 = vmatprep.subr.mxu0 %v919_v0  ;;  %668 = vmatprep.subr.mxu1 %v919_v0 }
  0x68   : > { %638 = vmatpush3.msra.mxu0 %v277_v9  ;;  %669 = vmatpush3.msra.mxu1 %v381_v24 }
  0x69   : > { %639 = vmatprep.subr.mxu0 %v919_v0  ;;  %670 = vmatprep.subr.mxu1 %v919_v0 }
  0x6a   : > { %640 = vmatpush3.msra.mxu0 %v276_v10  ;;  %671 = vmatpush3.msra.mxu1 %v380_v25 }
  0x6b   : > { %641 = vmatprep.subr.mxu0 %v919_v0  ;;  %672 = vmatprep.subr.mxu1 %v919_v0 }
  0x6c   : > { %642 = vmatpush3.msra.mxu0 %v275_v11  ;;  %673 = vmatpush3.msra.mxu1 %v379_v26 }
  0x6d   : > { %643 = vmatprep.subr.mxu0 %v919_v0  ;;  %674 = vmatprep.subr.mxu1 %v919_v0 }
  0x6e   : > { %644 = vmatpush3.msra.mxu0 %v274_v12  ;;  %675 = vmatpush3.msra.mxu1 %v378_v27 }
  0x6f   : > { %645 = vmatprep.subr.mxu0 %v919_v0  ;;  %676 = vmatprep.subr.mxu1 %v919_v0 }
  0x70   : > { %646 = vmatpush3.msra.mxu0 %v273_v13  ;;  %677 = vmatpush3.msra.mxu1 %v377_v28 }
  0x71   : > { %647 = vmatprep.subr.mxu0 %v919_v0  ;;  %678 = vmatprep.subr.mxu1 %v919_v0 }
  0x72   : > { %648 = vmatpush3.msra.mxu0 %v272_v14  ;;  %679 = vmatpush3.msra.mxu1 %v376_v29 }
  0x73   : > { %649 = vmatprep.subr.mxu0 %v919_v0  ;;  %680 = vmatprep.subr.mxu1 %v919_v0 }
  0x74   : > { %650 = vmatpush3.msra.mxu0 %v271_v15  ;;  %681 = vmatpush3.msra.mxu1 %v375_v30 }
  0x75   : > { %651 = vmatprep.subr.mxu0 %v919_v0  ;;  %682 = vmatprep.subr.mxu1 %v919_v0 }
  0x76   : > { %652 = vmatpush3.msra.mxu0 %v270_v16  ;;  %683 = vmatpush3.msra.mxu1 %v374_v31 }
  0x77   : > { %654 = vmatmul.mubr.f32.vlgmr.msra.gmra.mxu0 %v269_v17  ;;  %684 = vmatprep.subr.mxu1 %v919_v0 }
  0x78   : > { %685 = vmatpush3.msra.mxu1 %v373_v32 }
  0x79   : > { %686 = vmatprep.subr.mxu1 %v919_v0 }
  0x7a   : > { %687 = vmatpush3.msra.mxu1 %v372_v33 }
 0x137   : > { %v359_v35 = vpop.f32.mrf.mxu0 }
 0x138   : > { %v360_v36 = vadd.f32 %v581_v34, %v359_v35 }
 0x139   : > { %v655_v37 = vpop.f32.mrf.mxu0 }
 0x13a   : > { %v363_v38 = vmul.f32 %v360_v36, %v360_v36  ;;  %v365_v44 = vmul.f32 0.5, %v360_v36 }
 0x13c   : > { %v364_v39 = vmul.f32 %v363_v38, %v360_v36 }
 0x13e   : > { %v366_v40 = vmul.f32 0.044715, %v364_v39 }
 0x140   : > { %v367_v41 = vadd.f32 %v366_v40, %v360_v36 }
 0x142   : > { %v368_v42 = vmul.f32 0.7978846, %v367_v41 }
 0x144   : > { %762 = vtanh.f32 %v368_v42 }
 0x151   : > { %v763_v43 = vpop.eup %762 }
 0x152   : > { %v370_v45 = vadd.f32 1.0, %v763_v43 }
 0x154   : > { %v371_v46 = vmul.f32 %v370_v45, %v365_v44 }
 0x156   : > { %689 = vmatmul.mubr.f32.vlgmr.msra.gmra.mxu1 %v371_v46 }
 0x216   : > { %v461_v48 = vpop.f32.mrf.mxu1 }
 0x217   : > { %v462_v49 = vadd.f32 %v582_v47, %v461_v48 }
 0x218   : > { %v690_v50 = vpop.f32.mrf.mxu1 }
 0x219   : > { %465 = vst [vmem:[%s268_s12] sm:$0xff] %v462_v49 }
 0x21a   : > { %857 = shalt.err (!%p854_p9)
}
 0x21b   : > { %s858_s17 = scalar_lea.hbm %s1133_s28, 128  ;;  %s862_s26 = scalar_lea.hbm %s1175_s5, 256 }
 0x21c   : > { %p859_p13 = scmp.ne.s32.totalorder %s1133_s28, %s858_s17  ;;  %p863_p4 = scmp.lt.s32.totalorder %s1133_s28, %s1175_s5 }
 0x21d   : > { %p864_p8 = scmp.lt.s32.totalorder %s862_s26, %s858_s17 }
 0x21e   : > { %p860_p5 = pnand %p859_p13, %p1191_p0 }
 0x21f   : > { %p865_p3 = por %p864_p8, %p863_p4 }
 0x220   : > { %p861_p10 = pneg %p860_p5 }
 0x222   : > { %p866_p11 = pnand %p865_p3, %p861_p10 }
 0x224   : > { %869 = shalt.err (!%p866_p11)
}
 0x225   : > { %701 = dma.vmem_to_hbm [thread:$0]  (%p1191_p0), %s481_s30, 128, %s1133_s28, %s467_s7  }
 0x226 PF: > { %s492_s11 = sand.u32 1, %s900_s18   ;;  %p1192_p1 = scmp.ne.s32.totalorder %s1181_s25, 0 }
 0x227   : > { %p1193_p2 = scmp.ge.s32.totalorder %s912_s21, 2  ;;  %s493_s12 = scalar_lea.sflag [#allocation4], %s492_s11 }
 0x229   : > { %p715_p6 = pnand %p1193_p2, %p1192_p1 }
 0x22b   : > { %p716_p12 = pneg %p715_p6 }
 0x22d   : > { %895 = dma.done.wait (%p716_p12), %s493_s12, 128  }
 0x22e   : > { %897 = vsyncadd (%p716_p12), %s493_s12, 4294967168  ;;  %p19_p7 = scmp.ge.s32.totalorder %s1024_s15, 4   ;;  %s1194_s18 = smov %s904_s19 }
 0x22f   : > { %s1195_s19 = smov %s908_s20  ;;  %s1196_s20 = smov %s1040_s27 }
 0x230   : > { %s1197_s21 = smov %s1024_s15  ;;  %21 = sbr.rel (!%p19_p7) target bundleno = 6 (0x6), region = 93 }
 0x235   :  { %498 = vsyncpa [#allocation3], 1 }
 0x236   :  { %500 = vsyncpa [#allocation3 + $0x1], 1 }
 0x237   :  { %501 = vsyncpa [#allocation6], 1 }
 0x238   :  { %502 = vsyncpa [#allocation4], 1 }
 0x239   :  { %504 = vsyncpa [#allocation4 + $0x1], 1 }

// kernel: _mlp_pallas.1
= control target key start
LH: loop header
LB: loop body
LE: loop exit
PB: predicated region body
PF: predicated region fallthrough
CT: control target
= control target key end

     0   :  { %10 = vsyncpa [#allocation3], 0  ;;  %s1170_s0 = inlined_call_operand.hbm [shape: f32[16,128], index: 0, kind: input, shape index: {}]   ;;  %s1171_s1 = inlined_call_operand.hbm [shape: f32[128,128], index: 1, kind: input, shape index: {}]   ;;  %s1172_s2 = inlined_call_operand.vmem [shape: f32[1,128], index: 2, kind: input, shape index: {}]   ;;  %s1173_s3 = inlined_call_operand.hbm [shape: f32[128,128], index: 3, kind: input, shape index: {}]   ;;  %s1174_s4 = inlined_call_operand.vmem [shape: f32[1,128], index: 4, kind: input, shape index: {}]   ;;  %s1175_s5 = inlined_call_operand.hbm [shape: f32[16,128], index: 5, kind: output, shape index: {}]  }
   0x1   :  { %12 = vsyncpa [#allocation3 + $0x1], 0 }
   0x2   :  { %13 = vsyncpa [#allocation6], 0 }
   0x3   :  { %14 = vsyncpa [#allocation4], 0 }
   0x4   :  { %16 = vsyncpa [#allocation4 + $0x1], 0  ;;  %s952_s18 = smov 0   ;;  %s954_s19 = smov 0  }
   0x5   :  { %s956_s20 = smov 0   ;;  %s958_s21 = smov 0  }
   0x6 LB: > { %s973_s22 = sadd.s32 4294967295, %s912_s21   ;;  %s569_s23 = sadd.s32 4294967294, %s912_s21   ;;  %s912_s21 = sphi %s958_s21, %s1197_s21   ;;  %s908_s20 = sphi %s956_s20, %s1196_s20   ;;  %s904_s19 = sphi %s954_s19, %s1195_s19   ;;  %s900_s18 = sphi %s952_s18, %s1194_s18  }
   0x7   : > { %p42_p0 = scmp.ne.s32.totalorder %s904_s19, %s900_s18  ;;  %p1176_p1 = scmp.eq.s32.totalorder %s973_s22, 0 }
   0x8   : > { %p156_p3 = scmp.eq.s32.totalorder %s569_s23, 1  ;;  %p570_p5 = scmp.ge.s32.totalorder %s912_s21, 1 }
   0x9   : > { %p982_p4 = por %p1176_p1, %p42_p0  ;;  %p163_p7 = scmp.lt.s32.totalorder %s912_s21, 3 }
   0xa   : > { %p987_p6 = por %p156_p3, %p42_p0  ;;  %s914_s27 = smov [#allocation5]  }
   0xb   : > { %s1180_s24 = scalar_select %p982_p4, 1, 0 }
   0xc   : > { %s1181_s25 = scalar_select %p987_p6, 1, 0 }
   0xd   : > { %p992_p8 = pnand %p570_p5, %p163_p7  ;;  %s175_s28 = sshll.u32 %s914_s27, 4  ;;  %s176_s28 = int_to_ptr.vmem [resolvable:$true] %s175_s28 }
   0xe   : > { %s915_s30 = smov [#allocation7]   ;;  %s775_s7 = scalar_lea.vmem %s176_s28, 2048 }
   0xf   : > { %s1182_s26 = scalar_select %p992_p8, 1, 0 }
  0x10   : > { %p703_p9 = pneg %p992_p8  ;;  %s191_s6 = sshll.u32 %s915_s30, 4  ;;  %s192_s6 = int_to_ptr.vmem [resolvable:$true] %s191_s6 }
  0x11   : > { %p776_p13 = scmp.ne.s32.totalorder %s176_s28, %s775_s7  ;;  %p783_p5 = scmp.lt.s32.totalorder %s176_s28, %s176_s28 }
  0x12   : > { %p1001_p11 = pnand %p703_p9, %p1176_p1  ;;  %p784_p7 = scmp.lt.s32.totalorder %s775_s7, %s775_s7 }
  0x14   : > { %p766_p12 = pneg %p1001_p11  ;;  %p785_p10 = por %p784_p7, %p783_p5 }
  0x16   : > { %p778_p0 = pnand %p776_p13, %p766_p12 }
  0x18   : > { %p779_p3 = pneg %p778_p0 }
  0x1a   : > { %p786_p9 = pnand %p785_p10, %p779_p3 }
  0x1c   : > { %789 = shalt.err (!%p786_p9)
}
  0x1d   : > { %s916_s8 = smov 128   ;;  %s917_s9 = smov 8  }
  0x1e   : > { %706 = dma.hbm_to_vmem [thread:$0]  (!%p1001_p11), %s1171_s1, 2048, %s176_s28, [#allocation6], %s916_s8, %s916_s8, %s917_s9  }
  0x1f   : > { %s801_s12 = scalar_lea.vmem %s192_s6, 2048  ;;  %p809_p2 = scmp.lt.s32.totalorder %s192_s6, %s192_s6 }
  0x20   : > { %p802_p1 = scmp.ne.s32.totalorder %s192_s6, %s801_s12  ;;  %p810_p6 = scmp.lt.s32.totalorder %s801_s12, %s801_s12 }
  0x22   : > { %p804_p13 = pnand %p802_p1, %p766_p12  ;;  %p811_p5 = por %p810_p6, %p809_p2 }
  0x24   : > { %p805_p0 = pneg %p804_p13 }
  0x26   : > { %p812_p10 = pnand %p811_p5, %p805_p0 }
  0x28   : > { %815 = shalt.err (!%p812_p10)
}
  0x29   : > { %709 = dma.hbm_to_vmem [thread:$0]  (!%p1001_p11), %s1173_s3, 2048, %s192_s6, [#allocation6], %s916_s8, %s916_s8, %s917_s9  }
  0x2a   : > { %s1024_s15 = sadd.s32 1, %s912_s21   ;;  %s29_s16 = sadd.s32 1, %s908_s20 }
  0x2b   : > { %s26_s17 = ssub.s32 %s912_s21, %s1024_s15  ;;  %p36_p1 = scmp.ne.s32.totalorder %s908_s20, %s904_s19 }
  0x2c   : > { %p27_p2 = scmp.eq.s32.totalorder %s26_s17, 0  ;;  %p37_p6 = scmp.eq.s32.totalorder %s912_s21, 0 }
  0x2d   : > { %p1184_p12 = scmp.eq.s32.totalorder %s973_s22, 1  ;;  %p720_p7 = scmp.lt.s32.totalorder %s912_s21, 2 }
  0x2e   : > { %s1040_s27 = scalar_select %p27_p2, %s908_s20, %s29_s16  }
  0x2f   : > { %p1034_p3 = por %p1184_p12, %p36_p1  ;;  %p38_p9 = por %p37_p6, %p36_p1 }
  0x30   : > { %s208_s28 = sand.u32 1, %s908_s20   ;;  %s575_s30 = sshll.u32 %s912_s21, 7 }
  0x31   : > { %s1185_s23 = scalar_select %p1034_p3, 1, 0 }
  0x32   : > { %s574_s29 = sshll.u32 %s208_s28, 3  ;;  %s1047_s8 = scalar_lea.hbm %s1170_s0, %s575_s30 }
  0x33   : > { %s212_s9 = scalar_lea.vmem [#allocation2], %s574_s29  ;;  %p1049_p11 = pnand %p720_p7, %p38_p9 }
  0x34   : > { %s219_s10 = sshll.u32 %s212_s9, 4  ;;  %s209_s12 = scalar_lea.sflag [#allocation3], %s208_s28  ;;  %s220_s10 = int_to_ptr.vmem [resolvable:$true] %s219_s10 }
  0x35   : > { %s816_s13 = scalar_lea.hbm %s1047_s8, 128  ;;  %p818_p0 = pneg %p1049_p11 }
  0x36   : > { %p817_p13 = scmp.ne.s32.totalorder %s1047_s8, %s816_s13  ;;  %s821_s17 = scalar_lea.hbm %s1170_s0, 256 }
  0x37   : > { %p822_p1 = scmp.lt.s32.totalorder %s1047_s8, %s1170_s0  ;;  %p823_p2 = scmp.lt.s32.totalorder %s821_s17, %s816_s13 }
  0x38   : > { %p819_p5 = pnand %p818_p0, %p817_p13 }
  0x39   : > { %p824_p6 = por %p823_p2, %p822_p1 }
  0x3a   : > { %p820_p10 = pneg %p819_p5 }
  0x3c   : > { %p825_p12 = pnand %p824_p6, %p820_p10 }
  0x3e   : > { %828 = shalt.err (!%p825_p12)
}
  0x3f   : > { %s829_s6 = scalar_lea.vmem %s220_s10, 128  ;;  %s918_s28 = smov [#allocation2]  }
  0x40   : > { %p830_p7 = scmp.ne.s32.totalorder %s220_s10, %s829_s6  ;;  %s834_s7 = sshll.u32 %s918_s28, 4  ;;  %s835_s7 = int_to_ptr.vmem [resolvable:$false] %s834_s7 }
  0x41   : > { %s836_s9 = scalar_lea.vmem %s835_s7, 256  ;;  %p837_p13 = scmp.lt.s32.totalorder %s220_s10, %s835_s7 }
  0x42   : > { %p832_p9 = pnand %p830_p7, %p818_p0  ;;  %p838_p5 = scmp.lt.s32.totalorder %s836_s9, %s829_s6 }
  0x44   : > { %p833_p3 = pneg %p832_p9  ;;  %p839_p4 = por %p838_p5, %p837_p13 }
  0x46   : > { %p840_p8 = pnand %p839_p4, %p833_p3 }
  0x48   : > { %843 = shalt.err (!%p840_p8)
}
  0x49   : > { %713 = dma.hbm_to_vmem [thread:$0]  (!%p1049_p11), %s1047_s8, 128, %s220_s10, %s209_s12  }
  0x4a   : > { %p1187_p10 = scmp.ne.s32.totalorder %s1182_s26, 0 }
  0x4b   : > { %s1070_s13 = sand.u32 (!%p1187_p10), 1, %s904_s19   ;;  %p1188_p4 = scmp.ne.s32.totalorder (!%p1187_p10), %s1180_s24, 0 }
  0x4c   : > { %228 = sbr.rel (%p1187_p10) target bundleno = 550 (0x226), region = 40  ;;  %s577_s14 = sshll.u32 (!%p1187_p10), %s1070_s13, 3 }
  0x4d   : > { %s231_s16 = scalar_lea.sflag (!%p1187_p10), [#allocation3], %s1070_s13  ;;  %s1076_s17 = scalar_lea.vmem (!%p1187_p10), [#allocation2], %s577_s14 }
  0x51   : > { %887 = dma.done.wait (%p1188_p4), %s231_s16, 128  }
  0x52   : > { %889 = vsyncadd (%p1188_p4), %s231_s16, 4294967168  ;;  %p1189_p8 = scmp.eq.s32.totalorder %s973_s22, 0 }
  0x54   : > { %891 = dma.done.wait (%p1189_p8), [#allocation6], 4096   ;;  %p1190_p3 = pmov %p1189_p8 }
  0x55   : > { %v919_v0 = vmov 0.0   ;;  %vm920_vm0 = vmmov 0   ;;  %v285_v1 = vld [vmem:[#allocation5 + $0x78] sm:$0xff]  ;;  %v284_v2 = vld [vmem:[#allocation5 + $0x70] sm:$0xff]  ;;  %v283_v3 = vld [vmem:[#allocation5 + $0x68] sm:$0xff]  ;;  %s584_s11 = sshll.u32 %s973_s22, 7 }
  0x56   : > { %893 = vsyncadd (%p1190_p3), [#allocation6], 4294963200  ;;  %621 = vmatprep.subr.mxu0 %v919_v0  ;;  %653 = vmatprep.mubr.msk.f32.mxu0 %vm920_vm0, %v919_v0  ;;  %v282_v4 = vld [vmem:[#allocation5 + $0x60] sm:$0xff]  ;;  %v281_v5 = vld [vmem:[#allocation5 + $0x58] sm:$0xff]  ;;  %s268_s12 = scalar_lea.vmem [#allocation8], %s577_s14  ;;  %s1133_s28 = scalar_lea.hbm %s1175_s5, %s584_s11 }
  0x57   : > { %656 = vmatprep.subr.mxu1 %v919_v0  ;;  %688 = vmatprep.mubr.msk.f32.mxu1 %vm920_vm0, %v919_v0  ;;  %v280_v6 = vld [vmem:[#allocation5 + $0x50] sm:$0xff]  ;;  %v279_v7 = vld [vmem:[#allocation5 + $0x48] sm:$0xff]  ;;  %v278_v8 = vld [vmem:[#allocation5 + $0x40] sm:$0xff]  ;;  %s480_s30 = sshll.u32 %s268_s12, 4  ;;  %s467_s7 = scalar_lea.sflag [#allocation4], %s1070_s13  ;;  %s481_s30 = int_to_ptr.vmem [resolvable:$true] %s480_s30 }
  0x58   : > { %622 = vmatpush3.msra.mxu0 %v285_v1  ;;  %v277_v9 = vld [vmem:[#allocation5 + $0x38] sm:$0xff]  ;;  %v276_v10 = vld [vmem:[#allocation5 + $0x30] sm:$0xff]  ;;  %v275_v11 = vld [vmem:[#allocation5 + $0x28] sm:$0xff]  ;;  %s844_s9 = scalar_lea.vmem %s481_s30, 128  ;;  %p1191_p0 = scmp.ne.s32.totalorder %s1185_s23, 0 }
  0x59   : > { %623 = vmatprep.subr.mxu0 %v919_v0  ;;  %v274_v12 = vld [vmem:[#allocation5 + $0x20] sm:$0xff]  ;;  %v273_v13 = vld [vmem:[#allocation5 + $0x18] sm:$0xff]  ;;  %v272_v14 = vld [vmem:[#allocation5 + $0x10] sm:$0xff]  ;;  %p845_p11 = scmp.ne.s32.totalorder %s481_s30, %s844_s9  ;;  %s921_s22 = smov [#allocation8]  }
  0x5a   : > { %624 = vmatpush3.msra.mxu0 %v284_v2  ;;  %v271_v15 = vld [vmem:[#allocation5 + $0x8] sm:$0xff]  ;;  %v270_v16 = vld [vmem:[#allocation5] sm:$0xff]  ;;  %v269_v17 = vld [vmem:[%s1076_s17] sm:$0xff]  ;;  %s848_s16 = sshll.u32 %s921_s22, 4  ;;  %s849_s16 = int_to_ptr.vmem [resolvable:$false] %s848_s16 }
  0x5b   : > { %625 = vmatprep.subr.mxu0 %v919_v0  ;;  %v387_v18 = vld [vmem:[#allocation7 + $0x78] sm:$0xff]  ;;  %v386_v19 = vld [vmem:[#allocation7 + $0x70] sm:$0xff]  ;;  %v385_v20 = vld [vmem:[#allocation7 + $0x68] sm:$0xff]  ;;  %p846_p1 = pnand %p845_p11, %p1191_p0  ;;  %s850_s14 = scalar_lea.vmem %s849_s16, 256 }
  0x5c   : > { %626 = vmatpush3.msra.mxu0 %v283_v3  ;;  %657 = vmatpush3.msra.mxu1 %v387_v18  ;;  %v384_v21 = vld [vmem:[#allocation7 + $0x60] sm:$0xff]  ;;  %v383_v22 = vld [vmem:[#allocation7 + $0x58] sm:$0xff]  ;;  %v382_v23 = vld [vmem:[#allocation7 + $0x50] sm:$0xff]  ;;  %p851_p6 = scmp.lt.s32.totalorder %s481_s30, %s849_s16  ;;  %p852_p12 = scmp.lt.s32.totalorder %s850_s14, %s844_s9 }
  0x5d   : > { %627 = vmatprep.subr.mxu0 %v919_v0  ;;  %658 = vmatprep.subr.mxu1 %v919_v0  ;;  %v381_v24 = vld [vmem:[#allocation7 + $0x48] sm:$0xff]  ;;  %v380_v25 = vld [vmem:[#allocation7 + $0x40] sm:$0xff]  ;;  %v379_v26 = vld [vmem:[#allocation7 + $0x38] sm:$0xff]  ;;  %p847_p2 = pneg %p846_p1 }
  0x5e   : > { %628 = vmatpush3.msra.mxu0 %v282_v4  ;;  %659 = vmatpush3.msra.mxu1 %v386_v19  ;;  %v378_v27 = vld [vmem:[#allocation7 + $0x30] sm:$0xff]  ;;  %v377_v28 = vld [vmem:[#allocation7 + $0x28] sm:$0xff]  ;;  %v376_v29 = vld [vmem:[#allocation7 + $0x20] sm:$0xff]  ;;  %p853_p7 = por %p852_p12, %p851_p6 }
  0x5f   : > { %629 = vmatprep.subr.mxu0 %v919_v0  ;;  %660 = vmatprep.subr.mxu1 %v919_v0  ;;  %v375_v30 = vld [vmem:[#allocation7 + $0x18] sm:$0xff]  ;;  %v374_v31 = vld [vmem:[#allocation7 + $0x10] sm:$0xff]  ;;  %v373_v32 = vld [vmem:[#allocation7 + $0x8] sm:$0xff] }
  0x60   : > { %630 = vmatpush3.msra.mxu0 %v281_v5  ;;  %661 = vmatpush3.msra.mxu1 %v385_v20  ;;  %v372_v33 = vld [vmem:[#allocation7] sm:$0xff]  ;;  %v581_v34 = vld [vmem:[%s1172_s2] ss:$0 sm:$0xff]  ;;  %p854_p9 = pnand %p853_p7, %p847_p2 }
  0x61   : > { %631 = vmatprep.subr.mxu0 %v919_v0  ;;  %662 = vmatprep.subr.mxu1 %v919_v0  ;;  %v582_v47 = vld [vmem:[%s1174_s4] ss:$0 sm:$0xff] }
  0x62   : > { %632 = vmatpush3.msra.mxu0 %v280_v6  ;;  %663 = vmatpush3.msra.mxu1 %v384_v21 }
  0x63   : > { %633 = vmatprep.subr.mxu0 %v919_v0  ;;  %664 = vmatprep.subr.mxu1 %v919_v0 }
  0x64   : > { %634 = vmatpush3.msra.mxu0 %v279_v7  ;;  %665 = vmatpush3.msra.mxu1 %v383_v22 }
  0x65   : > { %635 = vmatprep.subr.mxu0 %v919_v0  ;;  %666 = vmatprep.subr.mxu1 %v919_v0 }
  0x66   : > { %636 = vmatpush3.msra.mxu0 %v278_v8  ;;  %667 = vmatpush3.msra.mxu1 %v382_v23 }
  0x67   : > { %637 = vmatprep.subr.mxu0 %v919_v0  ;;  %668 = vmatprep.subr.mxu1 %v919_v0 }
  0x68   : > { %638 = vmatpush3.msra.mxu0 %v277_v9  ;;  %669 = vmatpush3.msra.mxu1 %v381_v24 }
  0x69   : > { %639 = vmatprep.subr.mxu0 %v919_v0  ;;  %670 = vmatprep.subr.mxu1 %v919_v0 }
  0x6a   : > { %640 = vmatpush3.msra.mxu0 %v276_v10  ;;  %671 = vmatpush3.msra.mxu1 %v380_v25 }
  0x6b   : > { %641 = vmatprep.subr.mxu0 %v919_v0  ;;  %672 = vmatprep.subr.mxu1 %v919_v0 }
  0x6c   : > { %642 = vmatpush3.msra.mxu0 %v275_v11  ;;  %673 = vmatpush3.msra.mxu1 %v379_v26 }
  0x6d   : > { %643 = vmatprep.subr.mxu0 %v919_v0  ;;  %674 = vmatprep.subr.mxu1 %v919_v0 }
  0x6e   : > { %644 = vmatpush3.msra.mxu0 %v274_v12  ;;  %675 = vmatpush3.msra.mxu1 %v378_v27 }
  0x6f   : > { %645 = vmatprep.subr.mxu0 %v919_v0  ;;  %676 = vmatprep.subr.mxu1 %v919_v0 }
  0x70   : > { %646 = vmatpush3.msra.mxu0 %v273_v13  ;;  %677 = vmatpush3.msra.mxu1 %v377_v28 }
  0x71   : > { %647 = vmatprep.subr.mxu0 %v919_v0  ;;  %678 = vmatprep.subr.mxu1 %v919_v0 }
  0x72   : > { %648 = vmatpush3.msra.mxu0 %v272_v14  ;;  %679 = vmatpush3.msra.mxu1 %v376_v29 }
  0x73   : > { %649 = vmatprep.subr.mxu0 %v919_v0  ;;  %680 = vmatprep.subr.mxu1 %v919_v0 }
  0x74   : > { %650 = vmatpush3.msra.mxu0 %v271_v15  ;;  %681 = vmatpush3.msra.mxu1 %v375_v30 }
  0x75   : > { %651 = vmatprep.subr.mxu0 %v919_v0  ;;  %682 = vmatprep.subr.mxu1 %v919_v0 }
  0x76   : > { %652 = vmatpush3.msra.mxu0 %v270_v16  ;;  %683 = vmatpush3.msra.mxu1 %v374_v31 }
  0x77   : > { %654 = vmatmul.mubr.f32.vlgmr.msra.gmra.mxu0 %v269_v17  ;;  %684 = vmatprep.subr.mxu1 %v919_v0 }
  0x78   : > { %685 = vmatpush3.msra.mxu1 %v373_v32 }
  0x79   : > { %686 = vmatprep.subr.mxu1 %v919_v0 }
  0x7a   : > { %687 = vmatpush3.msra.mxu1 %v372_v33 }
 0x137   : > { %v359_v35 = vpop.f32.mrf.mxu0 }
 0x138   : > { %v360_v36 = vadd.f32 %v581_v34, %v359_v35 }
 0x139   : > { %v655_v37 = vpop.f32.mrf.mxu0 }
 0x13a   : > { %v363_v38 = vmul.f32 %v360_v36, %v360_v36  ;;  %v365_v44 = vmul.f32 0.5, %v360_v36 }
 0x13c   : > { %v364_v39 = vmul.f32 %v363_v38, %v360_v36 }
 0x13e   : > { %v366_v40 = vmul.f32 0.044715, %v364_v39 }
 0x140   : > { %v367_v41 = vadd.f32 %v366_v40, %v360_v36 }
 0x142   : > { %v368_v42 = vmul.f32 0.7978846, %v367_v41 }
 0x144   : > { %762 = vtanh.f32 %v368_v42 }
 0x151   : > { %v763_v43 = vpop.eup %762 }
 0x152   : > { %v370_v45 = vadd.f32 1.0, %v763_v43 }
 0x154   : > { %v371_v46 = vmul.f32 %v370_v45, %v365_v44 }
 0x156   : > { %689 = vmatmul.mubr.f32.vlgmr.msra.gmra.mxu1 %v371_v46 }
 0x216   : > { %v461_v48 = vpop.f32.mrf.mxu1 }
 0x217   : > { %v462_v49 = vadd.f32 %v582_v47, %v461_v48 }
 0x218   : > { %v690_v50 = vpop.f32.mrf.mxu1 }
 0x219   : > { %465 = vst [vmem:[%s268_s12] sm:$0xff] %v462_v49 }
 0x21a   : > { %857 = shalt.err (!%p854_p9)
}
 0x21b   : > { %s858_s17 = scalar_lea.hbm %s1133_s28, 128  ;;  %s862_s26 = scalar_lea.hbm %s1175_s5, 256 }
 0x21c   : > { %p859_p13 = scmp.ne.s32.totalorder %s1133_s28, %s858_s17  ;;  %p863_p4 = scmp.lt.s32.totalorder %s1133_s28, %s1175_s5 }
 0x21d   : > { %p864_p8 = scmp.lt.s32.totalorder %s862_s26, %s858_s17 }
 0x21e   : > { %p860_p5 = pnand %p859_p13, %p1191_p0 }
 0x21f   : > { %p865_p3 = por %p864_p8, %p863_p4 }
 0x220   : > { %p861_p10 = pneg %p860_p5 }
 0x222   : > { %p866_p11 = pnand %p865_p3, %p861_p10 }
 0x224   : > { %869 = shalt.err (!%p866_p11)
}
 0x225   : > { %701 = dma.vmem_to_hbm [thread:$0]  (%p1191_p0), %s481_s30, 128, %s1133_s28, %s467_s7  }
 0x226 PF: > { %s492_s11 = sand.u32 1, %s900_s18   ;;  %p1192_p1 = scmp.ne.s32.totalorder %s1181_s25, 0 }
 0x227   : > { %p1193_p2 = scmp.ge.s32.totalorder %s912_s21, 2  ;;  %s493_s12 = scalar_lea.sflag [#allocation4], %s492_s11 }
 0x229   : > { %p715_p6 = pnand %p1193_p2, %p1192_p1 }
 0x22b   : > { %p716_p12 = pneg %p715_p6 }
 0x22d   : > { %895 = dma.done.wait (%p716_p12), %s493_s12, 128  }
 0x22e   : > { %897 = vsyncadd (%p716_p12), %s493_s12, 4294967168  ;;  %p19_p7 = scmp.ge.s32.totalorder %s1024_s15, 4   ;;  %s1194_s18 = smov %s904_s19 }
 0x22f   : > { %s1195_s19 = smov %s908_s20  ;;  %s1196_s20 = smov %s1040_s27 }
 0x230   : > { %s1197_s21 = smov %s1024_s15  ;;  %21 = sbr.rel (!%p19_p7) target bundleno = 6 (0x6), region = 93 }
 0x235   :  { %498 = vsyncpa [#allocation3], 1 }
 0x236   :  { %500 = vsyncpa [#allocation3 + $0x1], 1 }
 0x237   :  { %501 = vsyncpa [#allocation6], 1 }
 0x238   :  { %502 = vsyncpa [#allocation4], 1 }
 0x239   :  { %504 = vsyncpa [#allocation4 + $0x1], 1 }

</bundles_post_ra>
